<compile_context>
chip_gen: v5e
topology: v5e:2x2
jax: 0.10.0
libtpu: 0.0.40
codegen_flags: <defaults>
</compile_context>

<pallas_src>
import jax
import jax.numpy as jnp
import numpy as np
from jax import lax
from jax.experimental import pallas as pl
from jax.experimental.pallas import tpu as pltpu

EPS_NORMALIZE = 1e-12   # torch.nn.functional.normalize default eps
EPS_COSINE = 1e-8       # torch.nn.functional.cosine_similarity default eps


def _adapter_kernel(x_ref, icv_unit_ref, scale_ref, o_ref):
    """One row-tile of the adapter forward pass.

    x_ref        : (R_TILE, H)  input activations (input dtype)
    icv_unit_ref : (Np, H)      L2-normalized ICVs (zero-padded rows), f32
    scale_ref    : (1, Np)      (-0.1/N) * alpha_i (zero on padded cols), f32
    o_ref        : (R_TILE, H)  output, same dtype as input
    """
    x = x_ref[...].astype(jnp.float32)                         # (R, H)
    icv_unit = icv_unit_ref[...]                               # (Np, H)
    scale = scale_ref[...]                                     # (1, Np)

    # ||x|| and 1/max(||x||, 1e-8) from one rsqrt per row.
    sumsq_x = jnp.sum(x * x, axis=-1, keepdims=True)           # (R, 1)
    inv_xn = lax.rsqrt(jnp.maximum(sumsq_x, EPS_COSINE * EPS_COSINE))
    x_norm = sumsq_x * inv_xn                                   # == sqrt(sumsq_x)

    # cosine_similarity(x, icv_i) for all i at once.  MXU matmul in the
    # natively-supported trans_b form: lhs (R, H) with H on lanes, rhs (Np, H)
    # with H on lanes -> no per-step relayout of the grid-invariant RHS.
    dots = lax.dot_general(
        x, icv_unit, (((1,), (1,)), ((), ())),
        preferred_element_type=jnp.float32)                    # (R, Np)
    cos = dots * inv_xn                                         # (R, Np)

    # lambda_i = 1 + relu(cos_i); fold the (-0.1/N) * alpha_i scale into the
    # tiny (R, Np) tensor, then reuse the same unit-ICV tile on the MXU.
    lam = (1.0 + jnp.maximum(cos, 0.0)) * scale                 # (R, Np)
    icv_all = jnp.dot(lam, icv_unit,
                      preferred_element_type=jnp.float32)       # (R, H)

    # out = normalize(normalize(x) + icv_all) * ||x||
    #     = z * (||x|| / ||z||)   with   z = x + ||x|| * icv_all
    # (avoids materializing x_unit; identical for rows with ||x|| > eps)
    z = x + x_norm * icv_all
    sumsq_z = jnp.sum(z * z, axis=-1, keepdims=True)
    inv_zn = lax.rsqrt(jnp.maximum(sumsq_z, EPS_NORMALIZE * EPS_NORMALIZE))
    o_ref[...] = (z * (x_norm * inv_zn)).astype(o_ref.dtype)


def _round_up(v, m):
    return ((v + m - 1) // m) * m


def _tpu_config():
    """Best-effort (vmem_capacity_bytes, num_tensorcores_per_chip) query."""
    vmem_cap = 128 << 20
    try:
        info = pltpu.get_tpu_info()
        cap = getattr(info, "vmem_capacity_bytes", None)
        if cap:
            vmem_cap = int(cap)
    except Exception:
        pass
    num_tc = 1
    try:
        kind = jax.devices()[0].device_kind.lower()
        if "v7" in kind or "7x" in kind:
            num_tc = 2
    except Exception:
        pass
    if vmem_cap <= (64 << 20):   # 64 MiB per TC is the v7x signature
        num_tc = max(num_tc, 2)
    return vmem_cap, num_tc


def _choose_row_tile(R, H, in_bytes, tile_budget_bytes, num_tc):
    """Largest multiple-of-128 row tile (<= 2048) fitting the VMEM budget.

    Accounts for double-buffered input + output blocks (input dtype) plus
    roughly four live f32 (row, H) temporaries inside the kernel.
    """
    per_row = H * (4 * in_bytes + 4 * 4)
    tile = min(2048, max(128, (tile_budget_bytes // per_row) // 128 * 128))
    # TODO(synk): for extreme H (>= ~24K rows of f32 I/O) even a 128-row block
    # exceeds the budget; an H-chunked two-pass path would be needed there.
    if num_tc > 1 and R > 128:
        # Guarantee >= num_tc grid steps so dimension_semantics=("parallel",)
        # actually feeds every TensorCore (v7x has 2 TCs per chip).
        tile = min(tile, _round_up(pl.cdiv(R, num_tc), 128))
    return max(128, tile)


def adapter_forward(x, icvs, alpha, *, row_tile=None):
    """Pallas implementation of AdapterLayer.forward.

    x     : (B, S, H) array (any float dtype; math in f32, cast back)
    icvs  : (N, H) array of in-context vectors (or None -> identity)
    alpha : (N,) array of per-ICV scales
    """
    if icvs is None:
        return x

    input_dtype = x.dtype
    B, S, H = x.shape
    N = icvs.shape[0]
    R = B * S
    in_bytes = jnp.dtype(input_dtype).itemsize

    # Generation-aware VMEM budgets: v7x has only 64 MiB per TensorCore, so
    # leave headroom; 128 MiB parts (v5e/v6e) can take much bigger tiles.
    vmem_cap, num_tc = _tpu_config()
    if vmem_cap <= (64 << 20):            # v7x-class
        vmem_limit = 48 << 20
        tile_budget = 30 << 20
    else:                                  # v5e / v6e
        vmem_limit = 96 << 20
        tile_budget = 72 << 20

    if row_tile is None:
        row_tile = _choose_row_tile(R, H, in_bytes, tile_budget, num_tc)
    # For small R a single full-extent block is both legal (block dim == full
    # array dim) and cheapest.
    row_tile = min(row_tile, R)
    num_tiles = pl.cdiv(R, row_tile)

    # No padding and no trailing slice: the grid runs on the unpadded (R, H)
    # matrix.  All per-row math is independent, so the (masked) garbage rows
    # of a ragged trailing block cannot affect valid rows, and Pallas clips
    # their writeback.  NOTE: keep this invariant if the kernel is extended —
    # any cross-row reduction would break it.
    x2d = x.reshape(R, H)

    # --- static parameter preprocessing (plain-JAX glue, runs once) --------
    Np = max(8, _round_up(N, 8))                    # pad ICV count to sublanes
    icvs_f = icvs.astype(jnp.float32)
    icvs_p = jnp.zeros((Np, H), jnp.float32).at[:N].set(icvs_f)
    icv_norm = jnp.sqrt(jnp.sum(icvs_p * icvs_p, axis=-1, keepdims=True))
    icv_unit = icvs_p / jnp.maximum(icv_norm, EPS_NORMALIZE)    # F.normalize
    # 0.1 * (-sum_i alpha_i * lam_i * unit_i) / N  ->  fold (-0.1/N)*alpha_i
    scale_row = jnp.zeros((1, Np), jnp.float32).at[0, :N].set(
        (-0.1 / float(N)) * jnp.asarray(alpha, jnp.float32))

    cost = pl.CostEstimate(
        flops=4 * R * H * Np,                       # two (R,Np)x(Np,H)-ish matmuls
        transcendentals=2 * R,                      # two rsqrt per row
        bytes_accessed=2 * R * H * in_bytes + Np * H * 4 + Np * 4,
    )

    out2d = pl.pallas_call(
        _adapter_kernel,
        out_shape=jax.ShapeDtypeStruct((R, H), input_dtype),
        grid_spec=pltpu.PrefetchScalarGridSpec(
            num_scalar_prefetch=0,
            grid=(num_tiles,),
            in_specs=[
                pl.BlockSpec((row_tile, H), lambda i: (i, 0)),   # x rows
                pl.BlockSpec((Np, H), lambda i: (0, 0)),          # unit ICVs
                pl.BlockSpec((1, Np), lambda i: (0, 0)),          # folded scales
            ],
            out_specs=pl.BlockSpec((row_tile, H), lambda i: (i, 0)),
        ),
        compiler_params=pltpu.CompilerParams(
            dimension_semantics=("parallel",),      # megacore sharding on v7x
            vmem_limit_bytes=vmem_limit),
        cost_estimate=cost,
    )(x2d, icv_unit, scale_row)

    return out2d.reshape(B, S, H)


def adapter_reference(x, icvs, alpha):
    """Pure-JAX (f32) reference mirroring the PyTorch forward exactly."""
    input_dtype = x.dtype
    xf = x.astype(jnp.float32)
    norm = jnp.linalg.norm(xf, axis=-1, keepdims=True)
    icv_all = jnp.zeros_like(xf)
    n = icvs.shape[0]
    for i in range(n):
        icv = icvs[i].astype(jnp.float32)
        icv_n = jnp.linalg.norm(icv)
        cos = jnp.sum(xf * icv[None, None, :], axis=-1) / jnp.maximum(
            norm[..., 0] * icv_n, EPS_COSINE)
        lam = (1.0 + jnp.maximum(0.0, cos))[..., None]
        icv_unit = icv / jnp.maximum(icv_n, EPS_NORMALIZE)
        icv_all = icv_all - alpha[i] * lam * icv_unit[None, None, :]
    icv_all = 0.1 * icv_all / n
    x_unit = xf / jnp.maximum(norm, EPS_NORMALIZE)
    y = x_unit + icv_all
    y = y / jnp.maximum(jnp.linalg.norm(y, axis=-1, keepdims=True),
                        EPS_NORMALIZE)
    return (y * norm).astype(input_dtype)


if __name__ == "__main__":
    key = jax.random.PRNGKey(0)
    kx, ki, kx2, ki2, kx3, ki3 = jax.random.split(key, 6)

    alpha = jnp.array([0.1, 0.2, 0.3], dtype=jnp.float32)
    N_ICV = 3

    # 1) Small shape from the module spec (R=16 -> single full-extent block).
    B, S, H = 2, 8, 32
    x = jax.random.normal(kx, (B, S, H), dtype=jnp.float32)
    icvs = jax.random.normal(ki, (N_ICV, H), dtype=jnp.float32)
    out = jax.block_until_ready(adapter_forward(x, icvs, alpha))
    ref = adapter_reference(x, icvs, alpha)
    np.testing.assert_allclose(np.asarray(out), np.asarray(ref),
                               rtol=1e-3, atol=1e-3)

    # 2) Larger shape using the auto (generation-aware) tiling path (R=640).
    B2, S2, H2 = 4, 160, 128
    x2 = jax.random.normal(kx2, (B2, S2, H2), dtype=jnp.float32)
    icvs2 = jax.random.normal(ki2, (N_ICV, H2), dtype=jnp.float32)
    out2 = jax.block_until_ready(adapter_forward(x2, icvs2, alpha))
    ref2 = adapter_reference(x2, icvs2, alpha)
    np.testing.assert_allclose(np.asarray(out2), np.asarray(ref2),
                               rtol=1e-3, atol=1e-3)

    # 3) Ragged grid with an explicit tile: R=600, tile=256 -> grid=3 with a
    #    masked 88-row trailing block (exercises the no-pad boundary path).
    B3, S3, H3 = 3, 200, 128
    x3 = jax.random.normal(kx3, (B3, S3, H3), dtype=jnp.float32)
    icvs3 = jax.random.normal(ki3, (N_ICV, H3), dtype=jnp.float32)
    out3 = jax.block_until_ready(adapter_forward(x3, icvs3, alpha,
                                                 row_tile=256))
    ref3 = adapter_reference(x3, icvs3, alpha)
    np.testing.assert_allclose(np.asarray(out3), np.asarray(ref3),
                               rtol=1e-3, atol=1e-3)

    print("KERNEL_OK")
</pallas_src>

<mosaic_0001>
module attributes {stable_mosaic.version = 11 : i64} {
  func.func @_adapter_kernel(%arg0: i32, %arg1: memref<16x32xf32, #tpu.memory_space<vmem>>, %arg2: memref<8x32xf32, #tpu.memory_space<vmem>>, %arg3: memref<1x8xf32, #tpu.memory_space<vmem>>, %arg4: memref<16x32xf32, #tpu.memory_space<vmem>>) attributes {dimension_semantics = [#tpu.dimension_semantics<parallel>], iteration_bounds = array<i64: 1>, scalar_prefetch = 0 : i64, scratch_operands = 0 : i64, tpu.core_type = #tpu.core_type<tc>, window_params = [{transform_indices = @transform_0, window_bounds = array<i64: 16, 32>}, {pipeline_mode = #tpu.pipeline_mode<synchronous>, transform_indices = @transform_1, window_bounds = array<i64: 8, 32>}, {pipeline_mode = #tpu.pipeline_mode<synchronous>, transform_indices = @transform_2, window_bounds = array<i64: 1, 8>}, {transform_indices = @transform_3, window_bounds = array<i64: 16, 32>}]} {
    %c0 = arith.constant 0 : index
    %c0_0 = arith.constant 0 : index
    %0 = vector.load %arg1[%c0, %c0_0] : memref<16x32xf32, #tpu.memory_space<vmem>>, vector<16x32xf32>
    %c0_1 = arith.constant 0 : index
    %c0_2 = arith.constant 0 : index
    %1 = vector.load %arg2[%c0_1, %c0_2] : memref<8x32xf32, #tpu.memory_space<vmem>>, vector<8x32xf32>
    %c0_3 = arith.constant 0 : index
    %c0_4 = arith.constant 0 : index
    %2 = vector.load %arg3[%c0_3, %c0_4] : memref<1x8xf32, #tpu.memory_space<vmem>>, vector<1x8xf32>
    %3 = arith.mulf %0, %0 : vector<16x32xf32>
    %cst = arith.constant dense<0.000000e+00> : vector<16xf32>
    %4 = vector.multi_reduction <add>, %3, %cst [1] : vector<16x32xf32> to vector<16xf32>
    %5 = vector.shape_cast %4 : vector<16xf32> to vector<16x1xf32>
    %cst_5 = arith.constant 1.000000e-16 : f32
    %6 = vector.broadcast %cst_5 : f32 to vector<16x1xf32>
    %7 = arith.maximumf %5, %6 : vector<16x1xf32>
    %8 = math.rsqrt %7 : vector<16x1xf32>
    %9 = arith.mulf %5, %8 : vector<16x1xf32>
    %cst_6 = arith.constant dense<0.000000e+00> : vector<16x8xf32>
    %10 = tpu.matmul %0, %1, %cst_6 {dimension_numbers = #tpu.dot_dimension_numbers<[1], [1], [0], [0], [0, 0, 1, 0], [], []>} : vector<16x32xf32>, vector<8x32xf32>, vector<16x8xf32> -> vector<16x8xf32>
    %11 = vector.broadcast %8 : vector<16x1xf32> to vector<16x8xf32>
    %12 = arith.mulf %10, %11 : vector<16x8xf32>
    %cst_7 = arith.constant 0.000000e+00 : f32
    %13 = vector.broadcast %cst_7 : f32 to vector<16x8xf32>
    %14 = arith.maximumf %12, %13 : vector<16x8xf32>
    %cst_8 = arith.constant 1.000000e+00 : f32
    %15 = vector.broadcast %cst_8 : f32 to vector<16x8xf32>
    %16 = arith.addf %15, %14 : vector<16x8xf32>
    %17 = vector.broadcast %2 : vector<1x8xf32> to vector<16x8xf32>
    %18 = arith.mulf %16, %17 : vector<16x8xf32>
    %cst_9 = arith.constant dense<0.000000e+00> : vector<16x32xf32>
    %19 = tpu.matmul %18, %1, %cst_9 {dimension_numbers = #tpu.dot_dimension_numbers<[1], [0], [0], [1], [0, 0, 1, 1], [], []>} : vector<16x8xf32>, vector<8x32xf32>, vector<16x32xf32> -> vector<16x32xf32>
    %20 = vector.broadcast %9 : vector<16x1xf32> to vector<16x32xf32>
    %21 = arith.mulf %20, %19 : vector<16x32xf32>
    %22 = arith.addf %0, %21 : vector<16x32xf32>
    %23 = arith.mulf %22, %22 : vector<16x32xf32>
    %cst_10 = arith.constant dense<0.000000e+00> : vector<16xf32>
    %24 = vector.multi_reduction <add>, %23, %cst_10 [1] : vector<16x32xf32> to vector<16xf32>
    %25 = vector.shape_cast %24 : vector<16xf32> to vector<16x1xf32>
    %cst_11 = arith.constant 1.000000e-24 : f32
    %26 = vector.broadcast %cst_11 : f32 to vector<16x1xf32>
    %27 = arith.maximumf %25, %26 : vector<16x1xf32>
    %28 = math.rsqrt %27 : vector<16x1xf32>
    %29 = arith.mulf %9, %28 : vector<16x1xf32>
    %30 = vector.broadcast %29 : vector<16x1xf32> to vector<16x32xf32>
    %31 = arith.mulf %22, %30 : vector<16x32xf32>
    %c0_12 = arith.constant 0 : index
    %c0_13 = arith.constant 0 : index
    %32 = vector.load %arg4[%c0_12, %c0_13] : memref<16x32xf32, #tpu.memory_space<vmem>>, vector<16x32xf32>
    tpu.vector_store %arg4[%c0_12, %c0_13], %31 {strides = array<i32>} : memref<16x32xf32, #tpu.memory_space<vmem>>, vector<16x32xf32>,
    return
  }
  func.func @transform_0(%arg0: i32) -> (i32, i32) {
    %c0_i32 = arith.constant 0 : i32
    %c0_i32_0 = arith.constant 0 : i32
    return %arg0, %c0_i32 : i32, i32
  }
  func.func @transform_1(%arg0: i32) -> (i32, i32) {
    %c0_i32 = arith.constant 0 : i32
    %c0_i32_0 = arith.constant 0 : i32
    %c0_i32_1 = arith.constant 0 : i32
    return %c0_i32, %c0_i32_0 : i32, i32
  }
  func.func @transform_2(%arg0: i32) -> (i32, i32) {
    %c0_i32 = arith.constant 0 : i32
    %c0_i32_0 = arith.constant 0 : i32
    %c0_i32_1 = arith.constant 0 : i32
    return %c0_i32, %c0_i32_0 : i32, i32
  }
  func.func @transform_3(%arg0: i32) -> (i32, i32) {
    %c0_i32 = arith.constant 0 : i32
    %c0_i32_0 = arith.constant 0 : i32
    return %arg0, %c0_i32 : i32, i32
  }
}

</mosaic_0001>

<bundles_post_ra>
// kernel: tpu_custom_call.1
= control target key start
LH: loop header
LB: loop body
LE: loop exit
PB: predicated region body
PF: predicated region fallthrough
CT: control target
= control target key end

     0   :  { %8 = vsyncpa [#allocation3], 0  ;;  %s377_s0 = inlined_call_operand.hbm [shape: f32[16,32], index: 0, kind: input, shape index: {}]   ;;  %s378_s1 = inlined_call_operand.hbm [shape: f32[8,32], index: 1, kind: input, shape index: {}]   ;;  %s379_s2 = inlined_call_operand.vmem [shape: f32[1,8], index: 2, kind: input, shape index: {}]   ;;  %s380_s3 = inlined_call_operand.hbm [shape: f32[16,32], index: 3, kind: output, shape index: {}]  }
   0x1   :  { %9 = vsyncpa [#allocation6], 0 }
   0x2   :  { %10 = vsyncpa [#allocation4], 0  ;;  %s15_s14 = sshll.u32 %s377_s0, 4  ;;  %s314_s15 = smov [#allocation2]   ;;  %s16_s14 = int_to_ptr.hbm [resolvable:$true] %s15_s14 }
   0x3   :  { %s17_s16 = sshll.u32 %s314_s15, 4  ;;  %s29_s19 = sshll.u32 %s378_s1, 4  ;;  %s18_s16 = int_to_ptr.vmem [resolvable:$true] %s17_s16  ;;  %s30_s19 = int_to_ptr.hbm [resolvable:$true] %s29_s19 }
   0x4   :  { %s315_s20 = smov 128   ;;  %s316_s21 = smov 8  }
   0x5   :  { %23 = dma.hbm_to_vmem [thread:$0]  %s16_s14, 256, %s18_s16, [#allocation3], %s315_s20, %s315_s20, %s316_s21  }
   0x6   :  { %s317_s22 = smov [#allocation5]  }
   0x7   :  { %s31_s23 = sshll.u32 %s317_s22, 4  ;;  %s32_s23 = int_to_ptr.vmem [resolvable:$true] %s31_s23 }
   0x8   :  { %34 = dma.hbm_to_vmem [thread:$0]  %s30_s19, 128, %s32_s23, [#allocation6]  }
   0x9   :  { %308 = dma.done.wait [#allocation3], 256  }
   0xa   :  { %309 = vsyncadd [#allocation3], 4294967040 }
   0xb   :  { %310 = dma.done.wait [#allocation6], 128  }
   0xc   :  { %311 = vsyncadd [#allocation6], 4294967168  ;;  %v348_v0 = vld [vmem:[#allocation2 + $0x8] sm:$0xff]  ;;  %vm51_vm0 = vcmask 261120   ;;  %v47_v1 = vld [vmem:[#allocation5] sm:$0xff]  ;;  %vm125_vm6 = vcmask 64512  }
   0xd   :  { %v50_v2 = vmul.f32 %v348_v0, %v348_v0  ;;  %220 = vmatpush.xpose.msk.msra.mxu2 %vm51_vm0, %v47_v1  ;;  %215 = vmatpush.xpose.msk.msra.mxu0 %vm51_vm0, %v47_v1  ;;  %v45_v3 = vld [vmem:[#allocation2] sm:$0xff]  ;;  %s201_s27 = sshll.u32 %s380_s3, 4  ;;  %s202_s27 = int_to_ptr.hbm [resolvable:$true] %s201_s27 }
   0xe   :  { %221 = vmatpush.msra.mxu3 %v47_v1  ;;  %147 = vmatpush.msra.mxu1 %v47_v1  ;;  %v49_v5 = vmul.f32 %v45_v3, %v45_v3  ;;  %v227_v26 = vld [vmem:[%s379_s2] ss:$0 sm:$0xff]  ;;  %s318_s2 = smov [#allocation7]  }
   0xf   :  { %v55_v4 = vsel %vm51_vm0, %v50_v2, 0.0  ;;  %s199_s24 = sshll.u32 %s318_s2, 4  ;;  %s200_s24 = int_to_ptr.vmem [resolvable:$true] %s199_s24 }
  0x10   :  { %56 = vadd.xlane.f32.xlu0 %v55_v4  ;;  %217 = vmatmul.msk.f32.vlgmr.msra.gmra.mxu2 %vm51_vm0, %v348_v0  ;;  %v52_v6 = vsel %vm51_vm0, %v49_v5, 0.0 }
  0x11   :  { %216 = vmatmul.msk.f32.vlgmr.msra.gmra.mxu0 %vm51_vm0, %v45_v3 }
  0x18   :  { %53 = vadd.xlane.f32.xlu0 %v52_v6 }
  0x83   :  { %v57_v7 = vpop.xlane.xlu0 %56 }
  0x84   :  { %v59_v8 = vmax.f32 %v57_v7, 1e-16 }
  0x86   :  { %228 = vrsqrt.f32 %v59_v8  ;;  %vm76_vm2 = vweird.f32 %v59_v8 }
  0x8b   :  { %v54_v9 = vpop.xlane.xlu0 %53 }
  0x8c   :  { %v229_v10 = vpop.eup %228  ;;  %v58_v11 = vmax.f32 %v54_v9, 1e-16 }
  0x8d   :  { %v71_v12 = vmul.f32 %v229_v10, %v59_v8  ;;  %vm77_vm1 = vweird.f32 %v229_v10 }
  0x8e   :  { %230 = vrsqrt.f32 %v58_v11  ;;  %vm78_vm3 = vmor %vm76_vm2, %vm77_vm1  ;;  %vm66_vm5 = vweird.f32 %v58_v11  ;;  %v108_v30 = vpop.f32.mrf.mxu0 }
  0x8f   :  { %v72_v13 = vmul.f32 %v229_v10, %v71_v12 }
  0x91   :  { %v73_v14 = vmul.f32 0.5, %v72_v13 }
  0x93   :  { %v74_v15 = vsub.f32 1.5, %v73_v14  ;;  %v111_v19 = vpop.f32.mrf.mxu2 }
  0x94   :  { %v231_v16 = vpop.eup %230 }
  0x95   :  { %v61_v17 = vmul.f32 %v231_v16, %v58_v11  ;;  %v75_v18 = vmul.f32 %v229_v10, %v74_v15  ;;  %vm67_vm4 = vweird.f32 %v231_v16 }
  0x96   :  { %vm68_vm7 = vmor %vm66_vm5, %vm67_vm4 }
  0x97   :  { %v62_v20 = vmul.f32 %v231_v16, %v61_v17  ;;  %v79_v21 = vsel %vm78_vm3, %v229_v10, %v75_v18 }
  0x98   :  { %v115_v22 = vmul.f32 %v111_v19, %v79_v21  ;;  %v359_v23 = vmul.f32 %v79_v21, %v57_v7 }
  0x99   :  { %v63_v24 = vmul.f32 0.5, %v62_v20 }
  0x9a   :  { %v117_v25 = vmax.f32 %v115_v22, 0.0 }
  0x9b   :  { %v64_v27 = vsub.f32 1.5, %v63_v24 }
  0x9c   :  { %v119_v28 = vadd.f32 1.0, %v117_v25 }
  0x9d   :  { %v65_v29 = vmul.f32 %v231_v16, %v64_v27 }
  0x9e   :  { %v124_v31 = vmul.f32 %v227_v26, %v119_v28 }
  0x9f   :  { %v69_v32 = vsel %vm68_vm7, %v231_v16, %v65_v29 }
  0xa0   :  { %v80_v33 = vmul.f32 %v69_v32, %v54_v9  ;;  %v114_v34 = vmul.f32 %v108_v30, %v69_v32  ;;  %219 = vmatmul.msk.f32.vlgmr.msra.gmra.mxu3 %vm125_vm6, %v124_v31 }
  0xa2   :  { %v116_v35 = vmax.f32 %v114_v34, 0.0 }
  0xa4   :  { %v118_v36 = vadd.f32 1.0, %v116_v35 }
  0xa6   :  { %v123_v37 = vmul.f32 %v227_v26, %v118_v36 }
  0xa8   :  { %218 = vmatmul.msk.f32.vlgmr.msra.gmra.mxu1 %vm125_vm6, %v123_v37 }
 0x123   :  { %v152_v38 = vpop.f32.mrf.mxu3 }
 0x124   :  { %v156_v41 = vmul.f32 %v152_v38, %v359_v23 }
 0x125   :  { %v149_v39 = vpop.f32.mrf.mxu1 }
 0x126   :  { %v155_v40 = vmul.f32 %v149_v39, %v80_v33  ;;  %v158_v44 = vadd.f32 %v156_v41, %v348_v0 }
 0x128   :  { %v157_v42 = vadd.f32 %v155_v40, %v45_v3  ;;  %v160_v46 = vmul.f32 %v158_v44, %v158_v44 }
 0x12a   :  { %v159_v43 = vmul.f32 %v157_v42, %v157_v42  ;;  %v164_v47 = vsel %vm51_vm0, %v160_v46, 0.0 }
 0x12c   :  { %v161_v45 = vsel %vm51_vm0, %v159_v43, 0.0 }
 0x12d   :  { %162 = vadd.xlane.f32.xlu1 %v161_v45 }
 0x135   :  { %165 = vadd.xlane.f32.xlu1 %v164_v47 }
 0x1a0   :  { %v163_v48 = vpop.xlane.xlu1 %162 }
 0x1a1   :  { %v167_v49 = vmax.f32 %v163_v48, 1e-24 }
 0x1a3   :  { %232 = vrsqrt.f32 %v167_v49  ;;  %vm175_vm9 = vweird.f32 %v167_v49 }
 0x1a8   :  { %v166_v50 = vpop.xlane.xlu1 %165 }
 0x1a9   :  { %v233_v51 = vpop.eup %232  ;;  %v168_v52 = vmax.f32 %v166_v50, 1e-24 }
 0x1aa   :  { %v170_v53 = vmul.f32 %v233_v51, %v167_v49  ;;  %vm176_vm8 = vweird.f32 %v233_v51 }
 0x1ab   :  { %234 = vrsqrt.f32 %v168_v52  ;;  %vm177_vm10 = vmor %vm175_vm9, %vm176_vm8  ;;  %vm185_vm12 = vweird.f32 %v168_v52 }
 0x1ac   :  { %v171_v54 = vmul.f32 %v233_v51, %v170_v53 }
 0x1ae   :  { %v172_v55 = vmul.f32 0.5, %v171_v54 }
 0x1b0   :  { %v173_v56 = vsub.f32 1.5, %v172_v55 }
 0x1b1   :  { %v235_v57 = vpop.eup %234 }
 0x1b2   :  { %v174_v58 = vmul.f32 %v233_v51, %v173_v56  ;;  %v180_v59 = vmul.f32 %v235_v57, %v168_v52  ;;  %vm186_vm11 = vweird.f32 %v235_v57 }
 0x1b3   :  { %vm187_vm13 = vmor %vm185_vm12, %vm186_vm11 }
 0x1b4   :  { %v178_v60 = vsel %vm177_vm10, %v233_v51, %v174_v58  ;;  %v181_v61 = vmul.f32 %v235_v57, %v180_v59 }
 0x1b5   :  { %v189_v62 = vmul.f32 %v178_v60, %v80_v33 }
 0x1b6   :  { %v182_v63 = vmul.f32 0.5, %v181_v61 }
 0x1b7   :  { %v191_v0 = vmul.f32 %v189_v62, %v157_v42 }
 0x1b8   :  { %v183_v1 = vsub.f32 1.5, %v182_v63 }
 0x1b9   :  { %193 = vst.msk [vmem:[#allocation7] sm:$0xff] %vm51_vm0, %v191_v0 }
 0x1ba   :  { %v184_v2 = vmul.f32 %v235_v57, %v183_v1 }
 0x1bc   :  { %v188_v3 = vsel %vm187_vm13, %v235_v57, %v184_v2 }
 0x1bd   :  { %v190_v4 = vmul.f32 %v188_v3, %v359_v23 }
 0x1bf   :  { %v192_v5 = vmul.f32 %v190_v4, %v158_v44 }
 0x1c1   :  { %194 = vst.msk [vmem:[#allocation7 + $0x8] sm:$0xff] %vm51_vm0, %v192_v5 }
 0x1c2   :  { %207 = dma.vmem_to_hbm [thread:$0]  %s200_s24, 256, %s202_s27, [#allocation4], %s315_s20, %s315_s20, %s316_s21  }
 0x1c3   :  { %312 = dma.done.wait [#allocation4], 256  }
 0x1c4   :  { %313 = vsyncadd [#allocation4], 4294967040 }
 0x1c5   :  { %212 = vsyncpa [#allocation3], 1 }
 0x1c6   :  { %213 = vsyncpa [#allocation6], 1 }
 0x1c7   :  { %214 = vsyncpa [#allocation4], 1 }

</bundles_post_ra>
